<compile_context>
chip_gen: v7x
topology: tpu7x:2x2x1
jax: 0.10.0
libtpu: 0.0.40
codegen_flags: <defaults>
</compile_context>

<pallas_src>
import jax
import jax.numpy as jnp
from jax import lax
from jax.experimental import pallas as pl
from jax.experimental.pallas import tpu as pltpu


def _round_up(x, m):
    return (x + m - 1) // m * m


def atis_batch_kernel(len_ref, batt_ref, feat_ref, wc_ref, bc_ref, wa_ref, wo_ref,
                      bo_ref, logits_ref):
    BB, T, U = feat_ref.shape
    H = wc_ref.shape[1]
    C = wo_ref.shape[1]

    # ---- connector Linear(U -> H): one (BB*T, U) x (U, H) MXU matmul, f32 acc ------
    feat2 = feat_ref[...].reshape(BB * T, U)                                  # bf16
    h = jnp.tanh(jnp.dot(feat2, wc_ref[...],
                         preferred_element_type=jnp.float32) + bc_ref[...])   # (M, H) f32
    h_bf = h.astype(jnp.bfloat16)
    h3 = h_bf.reshape(BB, T, H)                                               # (BB, T, H)

    # ---- SAP scores: batched MXU contraction over H; time stays on the lane axis ---
    q = jnp.broadcast_to(wa_ref[...], (BB, 1, H))                             # bf16
    s = jnp.einsum('bqh,bkh->bqk', q, h3,
                   preferred_element_type=jnp.float32)                        # (BB, 1, T)

    # additive mask built from lengths in-kernel (pad frames -> -1e5), + b_att shift
    t_idx = lax.broadcasted_iota(jnp.int32, (BB, 1, T), 2)
    mask = jnp.where(t_idx < len_ref[...], jnp.float32(0.0), jnp.float32(-100000.0))
    s = s + batt_ref[...] + mask

    # ---- numerically stable softmax over the lane (time) axis ----------------------
    m = jnp.max(s, axis=-1, keepdims=True)                                    # (BB, 1, 1)
    p = jnp.exp(s - m)                                                        # (BB, 1, T)
    denom = jnp.sum(p, axis=-1, keepdims=True)                                # (BB, 1, 1)

    # ---- classifier Linear(H -> C) per frame, then pooled (linear => identical) ----
    z = jnp.dot(h_bf, wo_ref[...], preferred_element_type=jnp.float32)        # (M, C) f32
    z3 = z.reshape(BB, T, C)
    pooled = jnp.einsum('bqk,bkc->bqc', p.astype(jnp.bfloat16),
                        z3.astype(jnp.bfloat16),
                        preferred_element_type=jnp.float32)                   # (BB, 1, C)
    logits = pooled / denom + bo_ref[...]
    logits_ref[...] = logits.astype(logits_ref.dtype)


def atis_forward(features_pad, lengths, labels, params, *, batch_block=8,
                 feature_dtype=jnp.bfloat16):
    """features_pad: [B, T, U] (ideally already bf16 and time-aligned);
    lengths: [B] int32 valid frame counts; labels: [B] int32 intent ids.
    Returns (scalar CE loss, [B, C] intent logits)."""
    B, T, U = features_pad.shape
    H = params['w_conn'].shape[1]
    C = params['w_out'].shape[1]

    T_pad = _round_up(T, 16)                      # bf16 sublane packing
    H_pad = _round_up(H, 128)
    C_pad = _round_up(C, 128)

    # physical VMEM budget (v7x = 64 MiB, v5e/v6e = 128 MiB)
    try:
        vmem_cap = int(pltpu.get_tpu_info().vmem_capacity_bytes)
    except Exception:
        vmem_cap = 64 << 20

    fsz = jnp.dtype(feature_dtype).itemsize
    BB = max(1, batch_block)
    # shrink the batch block if the double-buffered feature stream would not fit
    while BB > 1 and 2 * BB * T_pad * U * fsz > vmem_cap // 4:
        BB //= 2
    B_pad = _round_up(B, BB)

    # --- inputs (casts / pads are no-ops when the upstream already emits bf16 at
    #     aligned shapes -- the recommended production path; avoids re-streaming) ----
    feat = features_pad
    if feat.dtype != feature_dtype:
        feat = feat.astype(feature_dtype)
    if (B_pad, T_pad) != (B, T):
        feat = jnp.pad(feat, ((0, B_pad - B), (0, T_pad - T), (0, 0)))
    lens = jnp.pad(lengths.astype(jnp.int32), (0, B_pad - B)).reshape(B_pad, 1, 1)

    # --- weights (lane-padded with zeros; exactly preserves the H/C outputs) --------
    w_conn = jnp.pad(params['w_conn'], ((0, 0), (0, H_pad - H))).astype(feature_dtype)
    b_conn = jnp.pad(params['b_conn'], (0, H_pad - H)).reshape(1, H_pad).astype(jnp.float32)
    w_att = jnp.pad(params['w_att'], (0, H_pad - H)).reshape(1, H_pad).astype(feature_dtype)
    b_att = params['b_att'].reshape(1, 1).astype(jnp.float32)
    w_out = jnp.pad(params['w_out'], ((0, H_pad - H), (0, C_pad - C))).astype(feature_dtype)
    b_out = jnp.pad(params['b_out'], (0, C_pad - C)).reshape(1, C_pad).astype(jnp.float32)

    # --- VMEM accounting: 2x-buffered streams + single-buffered weights + working set
    per_step = BB * T_pad * U * fsz + BB * 4 + BB * C_pad * 4
    resident = (U * H_pad * fsz + H_pad * 4 + H_pad * fsz + 4
                + H_pad * C_pad * fsz + C_pad * 4)
    work = BB * T_pad * (H_pad * 6 + C_pad * 6 + 16)
    vmem_limit = int(min(max(2 * per_step + resident + work + (4 << 20), 16 << 20),
                         (vmem_cap * 3) // 4))

    const2 = lambda b: (0, 0)
    grid_spec = pltpu.PrefetchScalarGridSpec(
        num_scalar_prefetch=0,
        grid=(B_pad // BB,),
        in_specs=[
            pl.BlockSpec((BB, 1, 1), lambda b: (b, 0, 0)),                        # lengths
            pl.BlockSpec((1, 1), const2, pipeline_mode=pl.Buffered(1)),           # b_att
            pl.BlockSpec((BB, T_pad, U), lambda b: (b, 0, 0)),                    # features
            pl.BlockSpec((U, H_pad), const2, pipeline_mode=pl.Buffered(1)),       # w_conn
            pl.BlockSpec((1, H_pad), const2, pipeline_mode=pl.Buffered(1)),       # b_conn
            pl.BlockSpec((1, H_pad), const2, pipeline_mode=pl.Buffered(1)),       # w_att
            pl.BlockSpec((H_pad, C_pad), const2, pipeline_mode=pl.Buffered(1)),   # w_out
            pl.BlockSpec((1, C_pad), const2, pipeline_mode=pl.Buffered(1)),       # b_out
        ],
        out_specs=pl.BlockSpec((BB, 1, C_pad), lambda b: (b, 0, 0)),
    )

    logits_pad = pl.pallas_call(
        atis_batch_kernel,
        out_shape=jax.ShapeDtypeStruct((B_pad, 1, C_pad), jnp.float32),
        grid_spec=grid_spec,
        compiler_params=pltpu.CompilerParams(
            dimension_semantics=("parallel",),
            vmem_limit_bytes=vmem_limit),
    )(lens, b_att, feat, w_conn, b_conn, w_att, w_out, b_out)

    # Drop batch / class padding, then CrossEntropy + mean in plain JAX (negligible
    # FLOPs; keeps the kernel's batch axis purely parallel and labels out of VMEM).
    logits = logits_pad[:B, 0, :C]
    lse = jax.nn.logsumexp(logits, axis=-1)
    picked = jnp.take_along_axis(
        logits, labels.reshape(B, 1).astype(jnp.int32), axis=-1)[:, 0]
    loss = jnp.mean(lse - picked)
    return loss, logits


def init_params(key, upstream_dim, input_dim, output_dim):
    ks = jax.random.split(key, 6)
    s_c = 1.0 / jnp.sqrt(upstream_dim)
    s_a = 1.0 / jnp.sqrt(input_dim)
    return {
        'w_conn': jax.random.uniform(ks[0], (upstream_dim, input_dim), jnp.float32, -s_c, s_c),
        'b_conn': jax.random.uniform(ks[1], (input_dim,), jnp.float32, -s_c, s_c),
        'w_att':  jax.random.uniform(ks[2], (input_dim,), jnp.float32, -s_a, s_a),
        'b_att':  jax.random.uniform(ks[3], (1,), jnp.float32, -s_a, s_a),
        'w_out':  jax.random.uniform(ks[4], (input_dim, output_dim), jnp.float32, -s_a, s_a),
        'b_out':  jax.random.uniform(ks[5], (output_dim,), jnp.float32, -s_a, s_a),
    }


if __name__ == "__main__":
    # small, module-consistent shapes: batch, max seq, upstream_dim, input_dim, #intents
    B, T, U, H, C = 2, 16, 32, 32, 8
    key = jax.random.PRNGKey(0)
    k_feat, k_param, k_lab = jax.random.split(key, 3)

    # simulate pad_sequence over variable-length features; upstream emits bf16 features
    lengths = jnp.array([16, 11], dtype=jnp.int32)
    raw = jax.random.normal(k_feat, (B, T, U), jnp.float32)
    valid = (jnp.arange(T)[None, :] < lengths[:, None]).astype(jnp.float32)   # [B, T]
    features_pad = (raw * valid[:, :, None]).astype(jnp.bfloat16)             # zero pad frames

    labels = jax.random.randint(k_lab, (B,), 0, C, jnp.int32)                 # intent ids
    params = init_params(k_param, U, H, C)

    loss, intent_logits = atis_forward(features_pad, lengths, labels, params)
    loss = jax.block_until_ready(loss)
    intent_logits = jax.block_until_ready(intent_logits)

    # records['acc'] equivalent (host-side glue)
    predicted_intent = jnp.argmax(intent_logits, axis=-1)
    acc = (predicted_intent == labels).astype(jnp.float32)

    assert intent_logits.shape == (B, C)
    assert loss.shape == () and bool(jnp.isfinite(loss))
    print("KERNEL_OK")
</pallas_src>

<mosaic_0001>
module attributes {stable_mosaic.version = 11 : i64} {
  func.func @atis_batch_kernel(%arg0: i32, %arg1: memref<8x1x1xi32, #tpu.memory_space<vmem>>, %arg2: memref<1x1xf32, #tpu.memory_space<vmem>>, %arg3: memref<8x16x32xbf16, #tpu.memory_space<vmem>>, %arg4: memref<32x128xbf16, #tpu.memory_space<vmem>>, %arg5: memref<1x128xf32, #tpu.memory_space<vmem>>, %arg6: memref<1x128xbf16, #tpu.memory_space<vmem>>, %arg7: memref<128x128xbf16, #tpu.memory_space<vmem>>, %arg8: memref<1x128xf32, #tpu.memory_space<vmem>>, %arg9: memref<8x1x128xf32, #tpu.memory_space<vmem>>) attributes {dimension_semantics = [#tpu.dimension_semantics<parallel>], iteration_bounds = array<i64: 1>, scalar_prefetch = 0 : i64, scratch_operands = 0 : i64, tpu.core_type = #tpu.core_type<tc>, window_params = [{transform_indices = @transform_0, window_bounds = array<i64: 8, 1, 1>}, {pipeline_mode = #tpu.pipeline_mode<synchronous>, transform_indices = @transform_1, window_bounds = array<i64: 1, 1>}, {transform_indices = @transform_2, window_bounds = array<i64: 8, 16, 32>}, {pipeline_mode = #tpu.pipeline_mode<synchronous>, transform_indices = @transform_3, window_bounds = array<i64: 32, 128>}, {pipeline_mode = #tpu.pipeline_mode<synchronous>, transform_indices = @transform_4, window_bounds = array<i64: 1, 128>}, {pipeline_mode = #tpu.pipeline_mode<synchronous>, transform_indices = @transform_5, window_bounds = array<i64: 1, 128>}, {pipeline_mode = #tpu.pipeline_mode<synchronous>, transform_indices = @transform_6, window_bounds = array<i64: 128, 128>}, {pipeline_mode = #tpu.pipeline_mode<synchronous>, transform_indices = @transform_7, window_bounds = array<i64: 1, 128>}, {transform_indices = @transform_8, window_bounds = array<i64: 8, 1, 128>}]} {
    %c0 = arith.constant 0 : index
    %c0_0 = arith.constant 0 : index
    %c0_1 = arith.constant 0 : index
    %0 = vector.load %arg3[%c0, %c0_0, %c0_1] : memref<8x16x32xbf16, #tpu.memory_space<vmem>>, vector<8x16x32xbf16>
    %1 = vector.shape_cast %0 : vector<8x16x32xbf16> to vector<128x32xbf16>
    %c0_2 = arith.constant 0 : index
    %c0_3 = arith.constant 0 : index
    %2 = vector.load %arg4[%c0_2, %c0_3] : memref<32x128xbf16, #tpu.memory_space<vmem>>, vector<32x128xbf16>
    %cst = arith.constant dense<0.000000e+00> : vector<128x128xf32>
    %3 = tpu.matmul %1, %2, %cst {dimension_numbers = #tpu.dot_dimension_numbers<[1], [0], [0], [1], [0, 0, 1, 1], [], []>} : vector<128x32xbf16>, vector<32x128xbf16>, vector<128x128xf32> -> vector<128x128xf32>
    %c0_4 = arith.constant 0 : index
    %c0_5 = arith.constant 0 : index
    %4 = vector.load %arg5[%c0_4, %c0_5] : memref<1x128xf32, #tpu.memory_space<vmem>>, vector<1x128xf32>
    %5 = vector.broadcast %4 : vector<1x128xf32> to vector<128x128xf32>
    %6 = arith.addf %3, %5 : vector<128x128xf32>
    %7 = math.tanh %6 : vector<128x128xf32>
    %8 = arith.truncf %7 : vector<128x128xf32> to vector<128x128xbf16>
    %9 = vector.shape_cast %8 : vector<128x128xbf16> to vector<8x16x128xbf16>
    %c0_6 = arith.constant 0 : index
    %c0_7 = arith.constant 0 : index
    %10 = vector.load %arg6[%c0_6, %c0_7] : memref<1x128xbf16, #tpu.memory_space<vmem>>, vector<1x128xbf16>
    %11 = vector.shape_cast %10 : vector<1x128xbf16> to vector<1x1x128xbf16>
    %12 = vector.broadcast %11 : vector<1x1x128xbf16> to vector<8x1x128xbf16>
    "tpu.trace_start"() <{level = 10 : i32, message = "bqh,bkh->bqk"}> : () -> ()
    %cst_8 = arith.constant dense<0.000000e+00> : vector<8x1x16xf32>
    %13 = tpu.matmul %12, %9, %cst_8 {dimension_numbers = #tpu.dot_dimension_numbers<[2], [2], [1], [1], [0, 0, 0, 1, 1, 1], [0], [0]>} : vector<8x1x128xbf16>, vector<8x16x128xbf16>, vector<8x1x16xf32> -> vector<8x1x16xf32>
    "tpu.trace_stop"() : () -> ()
    %14 = tpu.iota {dimensions = array<i32: 2>} : vector<8x1x16xi32>
    %c0_9 = arith.constant 0 : index
    %c0_10 = arith.constant 0 : index
    %c0_11 = arith.constant 0 : index
    %15 = vector.load %arg1[%c0_9, %c0_10, %c0_11] : memref<8x1x1xi32, #tpu.memory_space<vmem>>, vector<8x1x1xi32>
    %16 = vector.broadcast %15 : vector<8x1x1xi32> to vector<8x1x16xi32>
    %17 = arith.cmpi slt, %14, %16 : vector<8x1x16xi32>
    %cst_12 = arith.constant 0.000000e+00 : f32
    %cst_13 = arith.constant -1.000000e+05 : f32
    %18 = vector.broadcast %cst_12 : f32 to vector<8x1x16xf32>
    %19 = vector.broadcast %cst_13 : f32 to vector<8x1x16xf32>
    %20 = arith.select %17, %18, %19 : vector<8x1x16xi1>, vector<8x1x16xf32>
    %c0_14 = arith.constant 0 : index
    %c0_15 = arith.constant 0 : index
    %21 = vector.load %arg2[%c0_14, %c0_15] : memref<1x1xf32, #tpu.memory_space<vmem>>, vector<1x1xf32>
    %22 = vector.shape_cast %21 : vector<1x1xf32> to vector<1x1x1xf32>
    %23 = vector.broadcast %22 : vector<1x1x1xf32> to vector<8x1x16xf32>
    %24 = arith.addf %13, %23 : vector<8x1x16xf32>
    %25 = arith.addf %24, %20 : vector<8x1x16xf32>
    %cst_16 = arith.constant dense<0xFF800000> : vector<8x1xf32>
    %26 = vector.multi_reduction <maximumf>, %25, %cst_16 [2] : vector<8x1x16xf32> to vector<8x1xf32>
    %27 = vector.shape_cast %26 : vector<8x1xf32> to vector<8x1x1xf32>
    %28 = vector.broadcast %27 : vector<8x1x1xf32> to vector<8x1x16xf32>
    %29 = arith.subf %25, %28 : vector<8x1x16xf32>
    %30 = math.exp %29 : vector<8x1x16xf32>
    %cst_17 = arith.constant dense<0.000000e+00> : vector<8x1xf32>
    %31 = vector.multi_reduction <add>, %30, %cst_17 [2] : vector<8x1x16xf32> to vector<8x1xf32>
    %32 = vector.shape_cast %31 : vector<8x1xf32> to vector<8x1x1xf32>
    %c0_18 = arith.constant 0 : index
    %c0_19 = arith.constant 0 : index
    %33 = vector.load %arg7[%c0_18, %c0_19] : memref<128x128xbf16, #tpu.memory_space<vmem>>, vector<128x128xbf16>
    %cst_20 = arith.constant dense<0.000000e+00> : vector<128x128xf32>
    %34 = tpu.matmul %8, %33, %cst_20 {dimension_numbers = #tpu.dot_dimension_numbers<[1], [0], [0], [1], [0, 0, 1, 1], [], []>} : vector<128x128xbf16>, vector<128x128xbf16>, vector<128x128xf32> -> vector<128x128xf32>
    %35 = vector.shape_cast %34 : vector<128x128xf32> to vector<8x16x128xf32>
    %36 = arith.truncf %30 : vector<8x1x16xf32> to vector<8x1x16xbf16>
    %37 = arith.truncf %35 : vector<8x16x128xf32> to vector<8x16x128xbf16>
    "tpu.trace_start"() <{level = 10 : i32, message = "bqk,bkc->bqc"}> : () -> ()
    %cst_21 = arith.constant dense<0.000000e+00> : vector<8x1x128xf32>
    %38 = tpu.matmul %36, %37, %cst_21 {dimension_numbers = #tpu.dot_dimension_numbers<[2], [1], [1], [2], [0, 0, 0, 1, 1, 2], [0], [0]>} : vector<8x1x16xbf16>, vector<8x16x128xbf16>, vector<8x1x128xf32> -> vector<8x1x128xf32>
    "tpu.trace_stop"() : () -> ()
    %39 = vector.broadcast %32 : vector<8x1x1xf32> to vector<8x1x128xf32>
    %40 = arith.divf %38, %39 : vector<8x1x128xf32>
    %c0_22 = arith.constant 0 : index
    %c0_23 = arith.constant 0 : index
    %41 = vector.load %arg8[%c0_22, %c0_23] : memref<1x128xf32, #tpu.memory_space<vmem>>, vector<1x128xf32>
    %42 = vector.shape_cast %41 : vector<1x128xf32> to vector<1x1x128xf32>
    %43 = vector.broadcast %42 : vector<1x1x128xf32> to vector<8x1x128xf32>
    %44 = arith.addf %40, %43 : vector<8x1x128xf32>
    %c0_24 = arith.constant 0 : index
    %c0_25 = arith.constant 0 : index
    %c0_26 = arith.constant 0 : index
    %45 = vector.load %arg9[%c0_24, %c0_25, %c0_26] : memref<8x1x128xf32, #tpu.memory_space<vmem>>, vector<8x1x128xf32>
    tpu.vector_store %arg9[%c0_24, %c0_25, %c0_26], %44 {strides = array<i32>} : memref<8x1x128xf32, #tpu.memory_space<vmem>>, vector<8x1x128xf32>,
    return
  }
  func.func @transform_0(%arg0: i32) -> (i32, i32, i32) {
    %c0_i32 = arith.constant 0 : i32
    %c0_i32_0 = arith.constant 0 : i32
    %c0_i32_1 = arith.constant 0 : i32
    return %arg0, %c0_i32, %c0_i32_0 : i32, i32, i32
  }
  func.func @transform_1(%arg0: i32) -> (i32, i32) {
    %c0_i32 = arith.constant 0 : i32
    %c0_i32_0 = arith.constant 0 : i32
    %c0_i32_1 = arith.constant 0 : i32
    return %c0_i32, %c0_i32_0 : i32, i32
  }
  func.func @transform_2(%arg0: i32) -> (i32, i32, i32) {
    %c0_i32 = arith.constant 0 : i32
    %c0_i32_0 = arith.constant 0 : i32
    %c0_i32_1 = arith.constant 0 : i32
    return %arg0, %c0_i32, %c0_i32_0 : i32, i32, i32
  }
  func.func @transform_3(%arg0: i32) -> (i32, i32) {
    %c0_i32 = arith.constant 0 : i32
    %c0_i32_0 = arith.constant 0 : i32
    %c0_i32_1 = arith.constant 0 : i32
    return %c0_i32, %c0_i32_0 : i32, i32
  }
  func.func @transform_4(%arg0: i32) -> (i32, i32) {
    %c0_i32 = arith.constant 0 : i32
    %c0_i32_0 = arith.constant 0 : i32
    %c0_i32_1 = arith.constant 0 : i32
    return %c0_i32, %c0_i32_0 : i32, i32
  }
  func.func @transform_5(%arg0: i32) -> (i32, i32) {
    %c0_i32 = arith.constant 0 : i32
    %c0_i32_0 = arith.constant 0 : i32
    %c0_i32_1 = arith.constant 0 : i32
    return %c0_i32, %c0_i32_0 : i32, i32
  }
  func.func @transform_6(%arg0: i32) -> (i32, i32) {
    %c0_i32 = arith.constant 0 : i32
    %c0_i32_0 = arith.constant 0 : i32
    %c0_i32_1 = arith.constant 0 : i32
    return %c0_i32, %c0_i32_0 : i32, i32
  }
  func.func @transform_7(%arg0: i32) -> (i32, i32) {
    %c0_i32 = arith.constant 0 : i32
    %c0_i32_0 = arith.constant 0 : i32
    %c0_i32_1 = arith.constant 0 : i32
    return %c0_i32, %c0_i32_0 : i32, i32
  }
  func.func @transform_8(%arg0: i32) -> (i32, i32, i32) {
    %c0_i32 = arith.constant 0 : i32
    %c0_i32_0 = arith.constant 0 : i32
    %c0_i32_1 = arith.constant 0 : i32
    return %arg0, %c0_i32, %c0_i32_0 : i32, i32, i32
  }
}

</mosaic_0001>

<bundles_post_ra>
// kernel: tpu_custom_call.1
= control target key start
LH: loop header
LB: loop body
LE: loop exit
PB: predicated region body
PF: predicated region fallthrough
CT: control target
= control target key end

     0   :  { %s2136_s0 = inlined_call_operand.vmem [shape: s32[8,1,1], index: 0, kind: input, shape index: {}]   ;;  %s2137_s1 = inlined_call_operand.<no memory space> [shape: f32[1,1], index: 1, kind: input, shape index: {}]   ;;  %s2138_s2 = inlined_call_operand.hbm [shape: bf16[8,16,32], index: 2, kind: input, shape index: {}]   ;;  %s2139_s3 = inlined_call_operand.vmem [shape: bf16[32,128], index: 3, kind: input, shape index: {}]   ;;  %s2140_s4 = inlined_call_operand.vmem [shape: f32[1,128], index: 4, kind: input, shape index: {}]   ;;  %s2141_s5 = inlined_call_operand.vmem [shape: bf16[1,128], index: 5, kind: input, shape index: {}]   ;;  %s2142_s6 = inlined_call_operand.hbm [shape: bf16[128,128], index: 6, kind: input, shape index: {}]   ;;  %s2143_s7 = inlined_call_operand.vmem [shape: f32[1,128], index: 7, kind: input, shape index: {}]   ;;  %s2144_s8 = inlined_call_operand.hbm [shape: f32[8,1,128], index: 8, kind: output, shape index: {}]  }
   0x1   :  { %v13_v0 = vstv %s2137_s1 }
   0x2   :  { %14 = vst [vmem:[#allocation2] sm:$0x1] %v13_v0 }
   0x3   :  { %15 = vsyncpa [#allocation4], 0 }
   0x4   :  { %16 = vsyncpa [#allocation7], 0 }
   0x5   :  { %17 = vsyncpa [#allocation5], 0  ;;  %s1761_s29 = smov [#allocation3]   ;;  %s1689_s11 = scalar_lea.hbm %s2138_s2, 1024 }
   0x6   :  { %s27_s30 = sshll.u32 %s1761_s29, 4  ;;  %p1690_p0 = scmp.ne.s32.totalorder %s2138_s2, %s1689_s11  ;;  %s28_s30 = int_to_ptr.vmem [resolvable:$true] %s27_s30 }
   0x7   :  { %p1693_p1 = scmp.lt.u32.totalorder %s1689_s11, %s2138_s2 }
   0x9   :  { %p1695_p2 = pnand %p1693_p1, %p1690_p0 }
   0xb   :  { %1698 = shalt.err (!%p1695_p2)
}
   0xc   :  { %s1699_s1 = scalar_lea.vmem %s28_s30, 1024  ;;  %p1704_p4 = scmp.lt.s32.totalorder %s28_s30, %s28_s30 }
   0xd   :  { %p1700_p3 = scmp.ne.s32.totalorder %s28_s30, %s1699_s1  ;;  %p1705_p5 = scmp.lt.s32.totalorder %s1699_s1, %s1699_s1 }
   0xf   :  { %p1706_p6 = por %p1705_p5, %p1704_p4 }
  0x11   :  { %p1707_p7 = pnand %p1706_p6, %p1700_p3 }
  0x13   :  { %1710 = shalt.err (!%p1707_p7)
}
  0x14   :  { %s1762_s16 = smov 64   ;;  %s1763_s17 = smov 4  }
  0x15   :  { %33 = dma.hbm_to_vmem [thread:$0]  %s2138_s2, 1024, %s28_s30, [#allocation4], %s1762_s16, %s1762_s16, %s1763_s17  }
  0x16   :  { %s1764_s20 = smov [#allocation6]   ;;  %s1711_s24 = scalar_lea.hbm %s2142_s6, 1024 }
  0x17   :  { %s45_s21 = sshll.u32 %s1764_s20, 4  ;;  %p1712_p8 = scmp.ne.s32.totalorder %s2142_s6, %s1711_s24  ;;  %s46_s21 = int_to_ptr.vmem [resolvable:$true] %s45_s21 }
  0x18   :  { %p1715_p9 = scmp.lt.u32.totalorder %s1711_s24, %s2142_s6 }
  0x1a   :  { %p1717_p10 = pnand %p1715_p9, %p1712_p8 }
  0x1c   :  { %1720 = shalt.err (!%p1717_p10)
}
  0x1d   :  { %s1721_s29 = scalar_lea.vmem %s46_s21, 1024  ;;  %p1726_p12 = scmp.lt.s32.totalorder %s46_s21, %s46_s21 }
  0x1e   :  { %p1722_p11 = scmp.ne.s32.totalorder %s46_s21, %s1721_s29  ;;  %p1727_p13 = scmp.lt.s32.totalorder %s1721_s29, %s1721_s29 }
  0x20   :  { %p1728_p0 = por %p1727_p13, %p1726_p12 }
  0x22   :  { %p1729_p1 = pnand %p1728_p0, %p1722_p11 }
  0x24   :  { %1732 = shalt.err (!%p1729_p1)
}
  0x25   :  { %51 = dma.hbm_to_vmem [thread:$0]  %s2142_s6, 1024, %s46_s21, [#allocation7], %s1762_s16, %s1762_s16, %s1763_s17  }
  0x26   :  { %1755 = dma.done.wait [#allocation4], 1024  }
  0x27   :  { %1756 = vsyncadd [#allocation4], 4294966272 }
  0x28   :  { %1757 = dma.done.wait [#allocation7], 1024  }
  0x29   :  { %1758 = vsyncadd [#allocation7], 4294966272  ;;  %v1607_v1 = vld [vmem:[%s2139_s3] sm:$0xff]   ;;  %v1608_v2 = vld [vmem:[%s2139_s3 + $0x8] sm:$0xff]   ;;  %vm140_vm0 = vcmask 261120   ;;  %v1765_v11 = vmov 0.0  }
  0x2a   :  { %1446 = vmatprep.subr.bf16.mxu0 %v1607_v1  ;;  %v1609_v3 = vld [vmem:[#allocation3] sm:$0xff]   ;;  %v1610_v4 = vld [vmem:[#allocation3 + $0x8] sm:$0xff]   ;;  %v1611_v5 = vld [vmem:[#allocation3 + $0x10] sm:$0xff]   ;;  %1466 = vmatprep.subr.bf16.mxu1 %v1765_v11  ;;  %vm1766_vm1 = vmmov 0   ;;  %v1767_v12 = vmov 0   ;;  %vm707_vm3 = vcmask 122880  }
  0x2b   :  { %1447 = vmatpush3.bf16.msra.mxu0 %v1607_v1  ;;  %1450 = vmatprep.mubr.msk.bf16.mxu0 %vm140_vm0, %v1609_v3  ;;  %v1612_v6 = vld [vmem:[#allocation3 + $0x18] sm:$0xff]   ;;  %v1613_v7 = vld [vmem:[#allocation3 + $0x20] sm:$0xff]   ;;  %v1614_v8 = vld [vmem:[#allocation3 + $0x28] sm:$0xff]   ;;  %vm957_vm11 = vcmask 130048  }
  0x2c   :  { %1448 = vmatprep.subr.bf16.mxu0 %v1608_v2  ;;  %v1615_v9 = vld [vmem:[#allocation3 + $0x30] sm:$0xff]   ;;  %v1616_v10 = vld [vmem:[#allocation3 + $0x38] sm:$0xff]   ;;  %1468 = vmatprep.mubr.msk.bf16.mxu1 %vm1766_vm1, %v1765_v11  ;;  %v292_v15 = vld [vmem:[%s2136_s0 + $0x3] sm:$0x1] }
  0x2d   :  { %1605 = vset.pattern.permute.xlu0 %v1767_v12  ;;  %v289_v13 = vld [vmem:[%s2136_s0] sm:$0x1]  ;;  %1606 = vset.pattern.permute.xlu1 %v1767_v12  ;;  %v294_v16 = vld [vmem:[%s2136_s0 + $0x5] sm:$0x1]  ;;  %v290_v17 = vld [vmem:[%s2136_s0 + $0x1] sm:$0x1] }
  0x2e   :  { %298 = vperm.xlu0 %1605, %v289_v13   ;;  %v369_v14 = vld [vmem:[#allocation2] sm:$0x1]  ;;  %v296_v18 = vld [vmem:[%s2136_s0 + $0x7] sm:$0x1]  ;;  %305 = vperm.xlu1 %1606, %v290_v17   ;;  %v291_v19 = vld [vmem:[%s2136_s0 + $0x2] sm:$0x1] }
  0x2f   :  { %1449 = vmatpush3.bf16.msra.mxu0 %v1608_v2  ;;  %v293_v20 = vld [vmem:[%s2136_s0 + $0x4] sm:$0x1]  ;;  %v295_v21 = vld [vmem:[%s2136_s0 + $0x6] sm:$0x1]  ;;  %v1891_v22 = vld [vmem:[%s2140_s4] ss:$0 sm:$0xff] }
  0x30   :  { %1490 = vmatprep.subr.bf16.mxu0 %v1765_v11  ;;  %v1914_v56 = vld [vmem:[%s2141_s5] sm:$0x1]  ;;  %v1617_v17 = vld [vmem:[#allocation6] sm:$0xff]  }
  0x32   :  { %1451 = vmatmul.mubr.msk.bf16.vlgmr.msra.gmra.mrb[0].mxu0 %vm140_vm0, %v1610_v4  ;;  %372 = vperm.xlu0 %1605, %v369_v14  }
  0x33   :  { %1454 = vmatprep.mubr.msk.bf16.mxu0 %vm140_vm0, %v1611_v5  ;;  %312 = vperm.xlu1 %1606, %v291_v19   ;;  %v1619_v19 = vld [vmem:[#allocation6 + $0x10] sm:$0xff]  }
  0x36   :  { %319 = vperm.xlu0 %1605, %v292_v15  }
  0x37   :  { %326 = vperm.xlu1 %1606, %v293_v20   ;;  %v1620_v20 = vld [vmem:[#allocation6 + $0x18] sm:$0xff]  }
  0x3a   :  { %1455 = vmatmul.mubr.msk.bf16.gmra.mrb[4].mxu0 %vm140_vm0, %v1612_v6  ;;  %333 = vperm.xlu0 %1605, %v294_v16  }
  0x3b   :  { %1458 = vmatprep.mubr.msk.bf16.mxu0 %vm140_vm0, %v1613_v7  ;;  %340 = vperm.xlu1 %1606, %v295_v21   ;;  %v1621_v21 = vld [vmem:[#allocation6 + $0x20] sm:$0xff]  }
  0x3e   :  { %347 = vperm.xlu0 %1605, %v296_v18   ;;  %v1618_v18 = vld [vmem:[#allocation6 + $0x8] sm:$0xff]  }
  0x42   :  { %1459 = vmatmul.mubr.msk.bf16.gmra.mrb[8].mxu0 %vm140_vm0, %v1614_v8 }
  0x43   :  { %1462 = vmatprep.mubr.msk.bf16.mxu0 %vm140_vm0, %v1615_v9 }
  0x4a   :  { %1463 = vmatmul.mubr.msk.bf16.gmra.mrb[12].mxu0 %vm140_vm0, %v1616_v10 }
  0x4b   :  { %1492 = vmatprep.mubr.msk.bf16.mxu0 %vm1766_vm1, %v1765_v11 }
 0x105   :  { %v1452_v23 = vpop.f32.mrb[0].mxu0 }
 0x106   :  { %v208_v24 = vadd.f32 %v1452_v23, %v1891_v22  ;;  %v199_v25 = vpop.f32.mrb[1].mxu0  ;;  %v1623_v23 = vld [vmem:[#allocation6 + $0x30] sm:$0xff]  }
 0x107   :  { %v200_v26 = vadd.f32 %v1891_v22, %v199_v25  ;;  %v1453_v27 = vpop.f32.mrb[2].mxu0  ;;  %v287_v25 = vlaneseq }
 0x108   :  { %1625 = vtanh.f32 %v208_v24  ;;  %v211_v28 = vadd.f32 %v1453_v27, %v1891_v22  ;;  %v202_v29 = vpop.f32.mrb[3].mxu0  ;;  %v1624_v24 = vld [vmem:[#allocation6 + $0x38] sm:$0xff]  }
 0x109   :  { %1627 = vtanh.f32 %v200_v26  ;;  %v203_v30 = vadd.f32 %v1891_v22, %v202_v29  ;;  %v301_v26 = vshrl.u32 %v287_v25, 7  ;;  %v1964_v29 = vand.u32 127, %v287_v25 }
 0x10a   :  { %1629 = vtanh.f32 %v211_v28  ;;  %v299_v28 = vpop.permute.xlu0 %298 }
 0x10b   :  { %1631 = vtanh.f32 %v203_v30  ;;  %v1962_v27 = vsub.s32 0, %v301_v26 }
 0x10d   :  { %v1456_v31 = vpop.f32.mrb[4].mxu0  ;;  %v303_v30 = vrot.slane %v299_v28, %v1962_v27 }
 0x10e   :  { %v224_v32 = vadd.f32 %v1456_v31, %v1891_v22  ;;  %v215_v33 = vpop.f32.mrb[5].mxu0  ;;  %v306_v31 = vpop.permute.xlu1 %305 }
 0x10f   :  { %v216_v34 = vadd.f32 %v1891_v22, %v215_v33  ;;  %v1457_v35 = vpop.f32.mrb[6].mxu0  ;;  %vm353_vm2 = vcmp.lt.s32.totalorder %v1964_v29, %v303_v30 }
 0x110   :  { %1633 = vtanh.f32 %v224_v32  ;;  %v227_v36 = vadd.f32 %v1457_v35, %v1891_v22  ;;  %v218_v37 = vpop.f32.mrb[7].mxu0  ;;  %v373_v32 = vpop.permute.xlu0 %372 }
 0x111   :  { %1635 = vtanh.f32 %v216_v34  ;;  %v219_v38 = vadd.f32 %v1891_v22, %v218_v37  ;;  %v1969_v33 = vrot.slane %v373_v32, %v1962_v27 }
 0x112   :  { %v1626_v39 = vpop.eup %1625  ;;  %1637 = vtanh.f32 %v227_v36  ;;  %v310_v36 = vrot.slane %v306_v31, %v1962_v27 }
 0x113   :  { %v1628_v40 = vpop.eup %1627  ;;  %1639 = vtanh.f32 %v219_v38  ;;  %v1768_v38 = vmov -100000.0  }
 0x114   :  { %v1630_v41 = vpop.eup %1629  ;;  %vm354_vm4 = vcmp.lt.s32.totalorder %v1964_v29, %v310_v36 }
 0x115   :  { %v1632_v42 = vpop.eup %1631  ;;  %v1460_v43 = vpop.f32.mrb[8].mxu0  ;;  %v1901_v44 = vpack.c.bf16 %v1630_v41, %v1626_v39  ;;  %v361_v39 = vsel %vm353_vm2, 0.0, %v1768_v38 }
 0x116   :  { %v240_v45 = vadd.f32 %v1460_v43, %v1891_v22  ;;  %v231_v46 = vpop.f32.mrb[9].mxu0  ;;  %v1904_v47 = vpack.c.bf16 %v1632_v42, %v1628_v40  ;;  %v313_v42 = vpop.permute.xlu1 %312 }
 0x117   :  { %v232_v48 = vadd.f32 %v1891_v22, %v231_v46  ;;  %v1461_v49 = vpop.f32.mrb[10].mxu0  ;;  %v362_v46 = vsel %vm354_vm4, 0.0, %v1768_v38 }
 0x118   :  { %1641 = vtanh.f32 %v240_v45  ;;  %v243_v50 = vadd.f32 %v1461_v49, %v1891_v22  ;;  %v234_v51 = vpop.f32.mrb[11].mxu0  ;;  %1467 = vmatpush3.bf16.xpose.msra.mxu1 %v1904_v47 }
 0x119   :  { %1643 = vtanh.f32 %v232_v48  ;;  %v235_v52 = vadd.f32 %v1891_v22, %v234_v51  ;;  %1472 = vmatprep.subr.bf16.mxu1 %v1765_v11  ;;  %v317_v51 = vrot.slane %v313_v42, %v1962_v27 }
 0x11a   :  { %v1634_v53 = vpop.eup %1633  ;;  %1645 = vtanh.f32 %v243_v50  ;;  %v327_v48 = vpop.permute.xlu1 %326 }
 0x11b   :  { %v1636_v54 = vpop.eup %1635  ;;  %1647 = vtanh.f32 %v235_v52  ;;  %vm355_vm5 = vcmp.lt.s32.totalorder %v1964_v29, %v317_v51 }
 0x11c   :  { %v1638_v55 = vpop.eup %1637 }
 0x11d   :  { %v1640_v57 = vpop.eup %1639  ;;  %v1464_v58 = vpop.f32.mrb[12].mxu0  ;;  %v1916_v59 = vpack.c.bf16 %v1638_v55, %v1634_v53 }
 0x11e   :  { %v256_v60 = vadd.f32 %v1464_v58, %v1891_v22  ;;  %v247_v61 = vpop.f32.mrb[13].mxu0  ;;  %v1919_v62 = vpack.c.bf16 %v1640_v57, %v1636_v54  ;;  %v331_v54 = vrot.slane %v327_v48, %v1962_v27  ;;  %v341_v57 = vpop.permute.xlu1 %340 }
 0x11f   :  { %v248_v63 = vadd.f32 %v1891_v22, %v247_v61  ;;  %v1465_v0 = vpop.f32.mrb[14].mxu0  ;;  %1469 = vmatmul.mubr.bf16.vlgmr.msra.gmra.mrb[0].mxu1 %v1914_v56 }
 0x120   :  { %1649 = vtanh.f32 %v256_v60  ;;  %v259_v1 = vadd.f32 %v1465_v0, %v1891_v22  ;;  %v250_v2 = vpop.f32.mrb[15].mxu0  ;;  %1473 = vmatpush3.bf16.xpose.msra.mxu1 %v1901_v44  ;;  %1474 = vmatprep.mubr.msk.bf16.mxu1 %vm1766_vm1, %v1765_v11  ;;  %vm357_vm6 = vcmp.lt.s32.totalorder %v1964_v29, %v331_v54 }
 0x121   :  { %1651 = vtanh.f32 %v248_v63  ;;  %v251_v3 = vadd.f32 %v1891_v22, %v250_v2  ;;  %1478 = vmatprep.subr.bf16.mxu1 %v1765_v11  ;;  %v1622_v22 = vld [vmem:[#allocation6 + $0x28] sm:$0xff]  }
 0x122   :  { %v1642_v4 = vpop.eup %1641  ;;  %1653 = vtanh.f32 %v259_v1  ;;  %v363_v1 = vsel %vm355_vm5, 0.0, %v1768_v38 }
 0x123   :  { %v1644_v5 = vpop.eup %1643  ;;  %1655 = vtanh.f32 %v251_v3 }
 0x124   :  { %v1646_v6 = vpop.eup %1645 }
 0x125   :  { %v1648_v7 = vpop.eup %1647  ;;  %v283_v8 = vpack.c.bf16 %v1646_v6, %v1642_v4  ;;  %v345_v4 = vrot.slane %v341_v57, %v1962_v27 }
 0x126   :  { %v282_v9 = vpack.c.bf16 %v1648_v7, %v1644_v5 }
 0x127   :  { %1475 = vmatmul.mubr.bf16.vlgmr.msra.gmra.mrb[4].mxu1 %v1914_v56  ;;  %vm359_vm8 = vcmp.lt.s32.totalorder %v1964_v29, %v345_v4 }
 0x128   :  { %1479 = vmatpush3.bf16.xpose.msra.mxu1 %v1919_v62  ;;  %1491 = vmatpush3.bf16.xpose.msra.mxu0 %v282_v9 }
 0x129   :  { %1480 = vmatprep.mubr.msk.bf16.mxu1 %vm1766_vm1, %v1765_v11  ;;  %1484 = vmatprep.subr.bf16.mxu1 %v1765_v11 }
 0x12a   :  { %v1650_v10 = vpop.eup %1649  ;;  %1502 = vmatprep.subr.bf16.mxu0 %v1765_v11 }
 0x12b   :  { %v1652_v12 = vpop.eup %1651 }
 0x12c   :  { %v1654_v13 = vpop.eup %1653 }
 0x12d   :  { %v1656_v14 = vpop.eup %1655  ;;  %v285_v15 = vpack.c.bf16 %v1654_v13, %v1650_v10 }
 0x12e   :  { %v284_v16 = vpack.c.bf16 %v1656_v14, %v1652_v12 }
 0x12f   :  { %1481 = vmatmul.mubr.bf16.vlgmr.msra.gmra.mrb[8].mxu1 %v1914_v56  ;;  %1493 = vmatmul.mubr.bf16.vlgmr.msra.gmra.mrb[16].mxu0 %v1914_v56 }
 0x130   :  { %1485 = vmatpush3.bf16.xpose.msra.mxu1 %v1916_v59  ;;  %1503 = vmatpush3.bf16.xpose.msra.mxu0 %v284_v16 }
 0x131   :  { %1486 = vmatprep.mubr.msk.bf16.mxu1 %vm1766_vm1, %v1765_v11  ;;  %1504 = vmatprep.mubr.msk.bf16.mxu0 %vm1766_vm1, %v1765_v11 }
 0x132   :  { %1496 = vmatprep.subr.bf16.mxu1 %v1765_v11  ;;  %1514 = vmatprep.subr.bf16.mxu0 %v1617_v17 }
 0x137   :  { %1487 = vmatmul.mubr.bf16.vlgmr.msra.gmra.mrb[12].mxu1 %v1914_v56  ;;  %1505 = vmatmul.mubr.bf16.vlgmr.msra.gmra.mrb[20].mxu0 %v1914_v56 }
 0x138   :  { %1497 = vmatpush3.bf16.xpose.msra.mxu1 %v283_v8  ;;  %1515 = vmatpush3.bf16.msra.mxu0 %v1617_v17 }
 0x139   :  { %1530 = vmatprep.mubr.bf16.mxu0 %v1904_v47  ;;  %1516 = vmatprep.subr.bf16.mxu0 %v1618_v18 }
 0x13a   :  { %1498 = vmatprep.mubr.msk.bf16.mxu1 %vm1766_vm1, %v1765_v11  ;;  %1508 = vmatprep.subr.bf16.mxu1 %v1765_v11 }
 0x13c   :  { %1517 = vmatpush3.bf16.msra.mxu0 %v1618_v18 }
 0x13d   :  { %1518 = vmatprep.subr.bf16.mxu0 %v1619_v19 }
 0x13f   :  { %1499 = vmatmul.mubr.bf16.vlgmr.msra.gmra.mrb[16].mxu1 %v1914_v56 }
 0x140   :  { %1509 = vmatpush3.bf16.xpose.msra.mxu1 %v285_v15  ;;  %1519 = vmatpush3.bf16.msra.mxu0 %v1619_v19 }
 0x141   :  { %1520 = vmatprep.subr.bf16.mxu0 %v1620_v20  ;;  %1510 = vmatprep.mubr.msk.bf16.mxu1 %vm1766_vm1, %v1765_v11 }
 0x142   :  { %1546 = vmatprep.subr.bf16.mxu1 %v1765_v11 }
 0x144   :  { %1521 = vmatpush3.bf16.msra.mxu0 %v1620_v20  ;;  %v367_v20 = vsel %vm359_vm8, 0.0, %v1768_v38 }
 0x145   :  { %1522 = vmatprep.subr.bf16.mxu0 %v1621_v21 }
 0x147   :  { %1511 = vmatmul.mubr.bf16.vlgmr.msra.gmra.mrb[20].mxu1 %v1914_v56  ;;  %v320_v56 = vpop.permute.xlu0 %319 }
 0x148   :  { %1523 = vmatpush3.bf16.msra.mxu0 %v1621_v21  ;;  %1548 = vmatprep.mubr.msk.bf16.mxu1 %vm1766_vm1, %v1765_v11  ;;  %v324_v3 = vrot.slane %v320_v56, %v1962_v27 }
 0x149   :  { %1524 = vmatprep.subr.bf16.mxu0 %v1622_v22 }
 0x14a   :  { %vm356_vm7 = vcmp.lt.s32.totalorder %v1964_v29, %v324_v3 }
 0x14b   :  { %v334_v12 = vpop.permute.xlu0 %333  ;;  %v364_v21 = vsel %vm356_vm7, 0.0, %v1768_v38 }
 0x14c   :  { %1525 = vmatpush3.bf16.msra.mxu0 %v1622_v22 }
 0x14d   :  { %1526 = vmatprep.subr.bf16.mxu0 %v1623_v23 }
 0x150   :  { %1527 = vmatpush3.bf16.msra.mxu0 %v1623_v23 }
 0x151   :  { %1528 = vmatprep.subr.bf16.mxu0 %v1624_v24 }
 0x154   :  { %1529 = vmatpush3.bf16.msra.mxu0 %v1624_v24  ;;  %v338_v24 = vrot.slane %v334_v12, %v1962_v27 }
 0x155   :  { %1588 = vmatprep.subr.bf16.mxu0 %v1765_v11 }
 0x156   :  { %vm358_vm9 = vcmp.lt.s32.totalorder %v1964_v29, %v338_v24 }
 0x157   :  { %1531 = vmatmul.mubr.bf16.vlgmr.msra.gmra.mrb[24].mxu0 %v1901_v44 }
 0x158   :  { %1534 = vmatprep.mubr.bf16.mxu0 %v1919_v62 }
 0x15f   :  { %1535 = vmatmul.mubr.bf16.gmra.mrb[28].mxu0 %v1916_v59 }
 0x160   :  { %1538 = vmatprep.mubr.bf16.mxu0 %v282_v9 }
 0x167   :  { %1539 = vmatmul.mubr.bf16.gmra.mrb[32].mxu0 %v283_v8  ;;  %v365_v8 = vsel %vm357_vm6, 0.0, %v1768_v38 }
 0x168   :  { %1542 = vmatprep.mubr.bf16.mxu0 %v284_v16 }
 0x16f   :  { %1543 = vmatmul.mubr.bf16.gmra.mrb[36].mxu0 %v285_v15 }
 0x170   :  { %1590 = vmatprep.mubr.msk.bf16.mxu0 %vm1766_vm1, %v1765_v11 }
 0x1f2   :  { %v413_v34 = vpop.f32.mrb[0].mxu1 }
 0x1f3   :  { %v414_v35 = vadd.f32 %v413_v34, %v1969_v33  ;;  %v1470_v37 = vpop.f32.mrb[1].mxu1  ;;  %v348_v34 = vpop.permute.xlu0 %347 }
 0x1f4   :  { %v416_v40 = vpop.f32.mrb[2].mxu1  ;;  %v352_v42 = vrot.slane %v348_v34, %v1962_v27 }
 0x1f5   :  { %v1974_v41 = vadd.f32 %v414_v35, %v361_v39  ;;  %v1471_v43 = vpop.f32.mrb[3].mxu1  ;;  %v366_v39 = vsel %vm358_vm9, 0.0, %v1768_v38 }
 0x1f6   :  { %vm360_vm10 = vcmp.lt.s32.totalorder %v1964_v29, %v352_v42 }
 0x1f7   :  { %v708_v44 = vsel %vm707_vm3, %v1974_v41, -inf }
 0x1f8   :  { %709 = vmax.xlane.f32.xlu1 %v708_v44 }
 0x1fa   :  { %v453_v45 = vpop.f32.mrb[4].mxu1 }
 0x1fb   :  { %v454_v47 = vadd.f32 %v453_v45, %v1969_v33  ;;  %v1476_v49 = vpop.f32.mrb[5].mxu1 }
 0x1fc   :  { %v456_v50 = vpop.f32.mrb[6].mxu1  ;;  %v368_v49 = vsel %vm360_vm10, 0.0, %v1768_v38 }
 0x1fd   :  { %v1982_v52 = vadd.f32 %v454_v47, %v362_v46  ;;  %v1477_v53 = vpop.f32.mrb[7].mxu1 }
 0x1ff   :  { %v711_v55 = vsel %vm707_vm3, %v1982_v52, -inf }
 0x200   :  { %712 = vmax.xlane.f32.xlu0 %v711_v55 }
 0x202   :  { %v493_v58 = vpop.f32.mrb[8].mxu1  ;;  %v573_v59 = vpop.f32.mrb[16].mxu0 }
 0x203   :  { %v494_v60 = vadd.f32 %v493_v58, %v1969_v33  ;;  %v574_v61 = vadd.f32 %v573_v59, %v1969_v33  ;;  %v1482_v62 = vpop.f32.mrb[9].mxu1  ;;  %v1494_v63 = vpop.f32.mrb[17].mxu0 }
 0x204   :  { %v576_v0 = vpop.f32.mrb[18].mxu0  ;;  %v496_v2 = vpop.f32.mrb[10].mxu1 }
 0x205   :  { %v1994_v5 = vadd.f32 %v494_v60, %v363_v1  ;;  %v1483_v6 = vpop.f32.mrb[11].mxu1  ;;  %v1495_v7 = vpop.f32.mrb[19].mxu0  ;;  %v1999_v10 = vadd.f32 %v574_v61, %v365_v8 }
 0x207   :  { %v714_v9 = vsel %vm707_vm3, %v1994_v5, -inf  ;;  %v720_v17 = vsel %vm707_vm3, %v1999_v10, -inf }
 0x208   :  { %715 = vmax.xlane.f32.xlu0 %v714_v9 }
 0x20a   :  { %v533_v13 = vpop.f32.mrb[12].mxu1  ;;  %v653_v14 = vpop.f32.mrb[20].mxu0 }
 0x20b   :  { %v534_v15 = vadd.f32 %v533_v13, %v1969_v33  ;;  %v654_v16 = vadd.f32 %v653_v14, %v1969_v33  ;;  %v1488_v18 = vpop.f32.mrb[13].mxu1  ;;  %v1506_v19 = vpop.f32.mrb[21].mxu0 }
 0x20c   :  { %721 = vmax.xlane.f32.xlu0 %v720_v17  ;;  %v536_v22 = vpop.f32.mrb[14].mxu1  ;;  %v656_v23 = vpop.f32.mrb[22].mxu0 }
 0x20d   :  { %v2010_v25 = vadd.f32 %v654_v16, %v367_v20  ;;  %v2012_v26 = vadd.f32 %v534_v15, %v364_v21  ;;  %v1489_v28 = vpop.f32.mrb[15].mxu1  ;;  %v1507_v30 = vpop.f32.mrb[23].mxu0 }
 0x20f   :  { %v726_v31 = vsel %vm707_vm3, %v2010_v25, -inf  ;;  %v717_v32 = vsel %vm707_vm3, %v2012_v26, -inf }
 0x210   :  { %727 = vmax.xlane.f32.xlu0 %v726_v31  ;;  %718 = vmax.xlane.f32.xlu1 %v717_v32 }
 0x212   :  { %v613_v35 = vpop.f32.mrb[16].mxu1 }
 0x213   :  { %v614_v36 = vadd.f32 %v613_v35, %v1969_v33  ;;  %v1500_v37 = vpop.f32.mrb[17].mxu1 }
 0x214   :  { %v616_v40 = vpop.f32.mrb[18].mxu1 }
 0x215   :  { %v2022_v43 = vadd.f32 %v614_v36, %v366_v39  ;;  %v1501_v44 = vpop.f32.mrb[19].mxu1 }
 0x217   :  { %v723_v45 = vsel %vm707_vm3, %v2022_v43, -inf }
 0x218   :  { %724 = vmax.xlane.f32.xlu1 %v723_v45 }
 0x21a   :  { %v693_v46 = vpop.f32.mrb[20].mxu1 }
 0x21b   :  { %v694_v47 = vadd.f32 %v693_v46, %v1969_v33  ;;  %v1512_v48 = vpop.f32.mrb[21].mxu1 }
 0x21c   :  { %v696_v50 = vpop.f32.mrb[22].mxu1 }
 0x21d   :  { %v2029_v51 = vadd.f32 %v694_v47, %v368_v49  ;;  %v1513_v53 = vpop.f32.mrb[23].mxu1 }
 0x21f   :  { %v729_v27 = vsel %vm707_vm3, %v2029_v51, -inf }
 0x220   :  { %730 = vmax.xlane.f32.xlu1 %v729_v27 }
 0x22a   :  { %v1532_v54 = vpop.f32.mrb[24].mxu0 }
 0x22b   :  { %v878_v55 = vpop.f32.mrb[25].mxu0 }
 0x22c   :  { %v1533_v56 = vpop.f32.mrb[26].mxu0 }
 0x22d   :  { %v950_v57 = vpack.c.bf16 %v1533_v56, %v1532_v54  ;;  %v881_v58 = vpop.f32.mrb[27].mxu0 }
 0x22e   :  { %v949_v29 = vpack.c.bf16 %v881_v58, %v878_v55 }
 0x230   :  { %1547 = vmatpush3.bf16.msra.mxu1 %v949_v29 }
 0x231   :  { %1552 = vmatprep.subr.bf16.mxu1 %v1765_v11 }
 0x232   :  { %v2034_v33 = vpop.f32.mrb[28].mxu0 }
 0x233   :  { %v894_v38 = vpop.f32.mrb[29].mxu0 }
 0x234   :  { %v2036_v59 = vpop.f32.mrb[30].mxu0 }
 0x235   :  { %v952_v60 = vpack.c.bf16 %v2036_v59, %v2034_v33  ;;  %v897_v61 = vpop.f32.mrb[31].mxu0 }
 0x236   :  { %v951_v62 = vpack.c.bf16 %v897_v61, %v894_v38 }
 0x23a   :  { %v2040_v63 = vpop.f32.mrb[32].mxu0 }
 0x23b   :  { %v2042_v0 = vpop.f32.mrb[33].mxu0 }
 0x23c   :  { %v2044_v1 = vpop.f32.mrb[34].mxu0 }
 0x23d   :  { %v954_v2 = vpack.c.bf16 %v2044_v1, %v2040_v63  ;;  %v2048_v3 = vpop.f32.mrb[35].mxu0 }
 0x23e   :  { %v953_v4 = vpack.c.bf16 %v2048_v3, %v2042_v0  ;;  %v2114_v0 = vld [vmem:[%s2143_s7] sm:$0x1]  ;;  %s1769_s7 = smov [#allocation8]  }
 0x23f   :  { %s1340_s29 = sshll.u32 %s1769_s7, 4  ;;  %s1341_s29 = int_to_ptr.vmem [resolvable:$true] %s1340_s29 }
 0x240   :  { %s1733_s2 = scalar_lea.vmem %s1341_s29, 128  ;;  %p1738_p3 = scmp.lt.s32.totalorder %s1341_s29, %s1341_s29 }
 0x241   :  { %p1734_p2 = scmp.ne.s32.totalorder %s1341_s29, %s1733_s2  ;;  %p1739_p4 = scmp.lt.s32.totalorder %s1733_s2, %s1733_s2 }
 0x242   :  { %v1544_v6 = vpop.f32.mrb[36].mxu0 }
 0x243   :  { %v2052_v7 = vpop.f32.mrb[37].mxu0  ;;  %p1740_p5 = por %p1739_p4, %p1738_p3 }
 0x244   :  { %v1545_v8 = vpop.f32.mrb[38].mxu0 }
 0x245   :  { %v956_v9 = vpack.c.bf16 %v1545_v8, %v1544_v6  ;;  %v2054_v12 = vpop.f32.mrb[39].mxu0  ;;  %p1741_p6 = pnand %p1740_p5, %p1734_p2 }
 0x246   :  { %v955_v13 = vpack.c.bf16 %v2054_v12, %v2052_v7 }
 0x247   :  { %1589 = vmatpush3.bf16.msra.mxu0 %v956_v9 }
 0x285   :  { %v710_v14 = vpop.xlane.xlu1 %709 }
 0x286   :  { %v732_v15 = vsub.f32 %v1974_v41, %v710_v14 }
 0x288   :  { %v740_v16 = vmul.f32 1.442695, %v732_v15 }
 0x28a   :  { %1657 = vpow2.f32 %v740_v16 }
 0x28d   :  { %v713_v17 = vpop.xlane.xlu0 %712 }
 0x28e   :  { %v733_v18 = vsub.f32 %v1982_v52, %v713_v17 }
 0x290   :  { %v742_v19 = vmul.f32 1.442695, %v733_v18 }
 0x292   :  { %1659 = vpow2.f32 %v742_v19 }
 0x294   :  { %v1658_v20 = vpop.eup %1657 }
 0x295   :  { %v716_v21 = vpop.xlane.xlu0 %715  ;;  %v756_v22 = vsel %vm707_vm3, %v1658_v20, 0.0  ;;  %v941_v23 = vpack.c.bf16 %v1658_v20, %v1658_v20 }
 0x296   :  { %v734_v24 = vsub.f32 %v1994_v5, %v716_v21  ;;  %757 = vadd.xlane.f32.xlu0 %v756_v22 }
 0x297   :  { %1549 = vmatmul.mubr.msk.bf16.vlgmr.msra.gmra.mrb[24].mxu1 %vm957_vm11, %v941_v23 }
 0x298   :  { %v744_v28 = vmul.f32 1.442695, %v734_v24  ;;  %1553 = vmatpush3.bf16.msra.mxu1 %v950_v57  ;;  %1554 = vmatprep.mubr.msk.bf16.mxu1 %vm1766_vm1, %v1765_v11 }
 0x299   :  { %v722_v41 = vpop.xlane.xlu0 %721  ;;  %1558 = vmatprep.subr.bf16.mxu1 %v1765_v11 }
 0x29a   :  { %1661 = vpow2.f32 %v744_v28  ;;  %v736_v52 = vsub.f32 %v1999_v10, %v722_v41 }
 0x29c   :  { %v1660_v30 = vpop.eup %1659  ;;  %v748_v31 = vmul.f32 1.442695, %v736_v52 }
 0x29d   :  { %v728_v32 = vpop.xlane.xlu0 %727  ;;  %v719_v34 = vpop.xlane.xlu1 %718  ;;  %v759_v5 = vsel %vm707_vm3, %v1660_v30, 0.0  ;;  %v942_v35 = vpack.c.bf16 %v1660_v30, %v1660_v30 }
 0x29e   :  { %1663 = vpow2.f32 %v748_v31  ;;  %v738_v36 = vsub.f32 %v2010_v25, %v728_v32  ;;  %v735_v37 = vsub.f32 %v2012_v26, %v719_v34  ;;  %760 = vadd.xlane.f32.xlu1 %v759_v5 }
 0x29f   :  { %1555 = vmatmul.mubr.msk.bf16.vlgmr.msra.gmra.mrb[28].mxu1 %vm957_vm11, %v942_v35 }
 0x2a0   :  { %v752_v39 = vmul.f32 1.442695, %v738_v36  ;;  %v746_v40 = vmul.f32 1.442695, %v735_v37  ;;  %1559 = vmatpush3.bf16.msra.mxu1 %v951_v62  ;;  %1560 = vmatprep.mubr.msk.bf16.mxu1 %vm1766_vm1, %v1765_v11 }
 0x2a1   :  { %1564 = vmatprep.subr.bf16.mxu1 %v1765_v11 }
 0x2a2   :  { %1665 = vpow2.f32 %v752_v39 }
 0x2a3   :  { %1667 = vpow2.f32 %v746_v40 }
 0x2a4   :  { %v1662_v10 = vpop.eup %1661 }
 0x2a5   :  { %v725_v42 = vpop.xlane.xlu1 %724  ;;  %v762_v44 = vsel %vm707_vm3, %v1662_v10, 0.0  ;;  %v943_v25 = vpack.c.bf16 %v1662_v10, %v1662_v10 }
 0x2a6   :  { %v737_v26 = vsub.f32 %v2022_v43, %v725_v42  ;;  %763 = vadd.xlane.f32.xlu0 %v762_v44 }
 0x2a7   :  { %1561 = vmatmul.mubr.msk.bf16.vlgmr.msra.gmra.mrb[32].mxu1 %vm957_vm11, %v943_v25 }
 0x2a8   :  { %v1664_v45 = vpop.eup %1663  ;;  %v750_v46 = vmul.f32 1.442695, %v737_v26  ;;  %1565 = vmatpush3.bf16.msra.mxu1 %v952_v60  ;;  %1566 = vmatprep.mubr.msk.bf16.mxu1 %vm1766_vm1, %v1765_v11 }
 0x2a9   :  { %v768_v47 = vsel %vm707_vm3, %v1664_v45, 0.0  ;;  %1570 = vmatprep.subr.bf16.mxu1 %v1765_v11  ;;  %v945_v57 = vpack.c.bf16 %v1664_v45, %v1664_v45 }
 0x2aa   :  { %1669 = vpow2.f32 %v750_v46  ;;  %769 = vadd.xlane.f32.xlu0 %v768_v47 }
 0x2ac   :  { %v1666_v48 = vpop.eup %1665 }
 0x2ad   :  { %v1668_v43 = vpop.eup %1667  ;;  %v731_v49 = vpop.xlane.xlu1 %730  ;;  %v774_v50 = vsel %vm707_vm3, %v1666_v48, 0.0  ;;  %v947_v59 = vpack.c.bf16 %v1666_v48, %v1666_v48 }
 0x2ae   :  { %v739_v53 = vsub.f32 %v2029_v51, %v731_v49  ;;  %775 = vadd.xlane.f32.xlu0 %v774_v50  ;;  %v765_v27 = vsel %vm707_vm3, %v1668_v43, 0.0  ;;  %v944_v54 = vpack.c.bf16 %v1668_v43, %v1668_v43 }
 0x2af   :  { %766 = vadd.xlane.f32.xlu1 %v765_v27 }
 0x2b0   :  { %v754_v55 = vmul.f32 1.442695, %v739_v53  ;;  %1567 = vmatmul.mubr.msk.bf16.vlgmr.msra.gmra.mrb[36].mxu1 %vm957_vm11, %v944_v54 }
 0x2b1   :  { %1571 = vmatpush3.bf16.msra.mxu1 %v953_v4  ;;  %1572 = vmatprep.mubr.msk.bf16.mxu1 %vm1766_vm1, %v1765_v11 }
 0x2b2   :  { %1671 = vpow2.f32 %v754_v55  ;;  %1576 = vmatprep.subr.bf16.mxu1 %v1765_v11 }
 0x2b4   :  { %v1670_v56 = vpop.eup %1669 }
 0x2b5   :  { %v771_v51 = vsel %vm707_vm3, %v1670_v56, 0.0  ;;  %v946_v38 = vpack.c.bf16 %v1670_v56, %v1670_v56 }
 0x2b6   :  { %772 = vadd.xlane.f32.xlu1 %v771_v51 }
 0x2b8   :  { %1573 = vmatmul.mubr.msk.bf16.vlgmr.msra.gmra.mrb[40].mxu1 %vm957_vm11, %v945_v57 }
 0x2b9   :  { %1577 = vmatpush3.bf16.msra.mxu1 %v954_v2  ;;  %1578 = vmatprep.mubr.msk.bf16.mxu1 %vm1766_vm1, %v1765_v11 }
 0x2ba   :  { %1582 = vmatprep.subr.bf16.mxu1 %v1765_v11 }
 0x2bc   :  { %v1672_v58 = vpop.eup %1671 }
 0x2bd   :  { %v948_v29 = vpack.c.bf16 %v1672_v58, %v1672_v58  ;;  %v777_v33 = vsel %vm707_vm3, %v1672_v58, 0.0 }
 0x2be   :  { %778 = vadd.xlane.f32.xlu1 %v777_v33 }
 0x2bf   :  { %1591 = vmatmul.mubr.msk.bf16.vlgmr.msra.gmra.mrb[40].mxu0 %vm957_vm11, %v948_v29 }
 0x2c0   :  { %1579 = vmatmul.mubr.msk.bf16.vlgmr.msra.gmra.mrb[44].mxu1 %vm957_vm11, %v946_v38 }
 0x2c1   :  { %1583 = vmatpush3.bf16.msra.mxu1 %v955_v13  ;;  %1584 = vmatprep.mubr.msk.bf16.mxu1 %vm1766_vm1, %v1765_v11 }
 0x2c8   :  { %1585 = vmatmul.mubr.msk.bf16.vlgmr.msra.gmra.mrb[48].mxu1 %vm957_vm11, %v947_v59 }
 0x323   :  { %v758_v60 = vpop.xlane.xlu0 %757 }
 0x324   :  { %1673 = vrcp.f32 %v758_v60 }
 0x32b   :  { %v761_v61 = vpop.xlane.xlu1 %760 }
 0x32c   :  { %1675 = vrcp.f32 %v761_v61 }
 0x32e   :  { %v1674_v62 = vpop.eup %1673 }
 0x333   :  { %v764_v4 = vpop.xlane.xlu0 %763 }
 0x334   :  { %1677 = vrcp.f32 %v764_v4 }
 0x336   :  { %v1676_v7 = vpop.eup %1675 }
 0x337   :  { %v770_v24 = vpop.xlane.xlu0 %769 }
 0x33b   :  { %v776_v42 = vpop.xlane.xlu0 %775 }
 0x33c   :  { %v767_v16 = vpop.xlane.xlu1 %766 }
 0x33d   :  { %1679 = vrcp.f32 %v767_v16 }
 0x33e   :  { %v1678_v17 = vpop.eup %1677  ;;  %1681 = vrcp.f32 %v770_v24 }
 0x343   :  { %v773_v28 = vpop.xlane.xlu1 %772 }
 0x347   :  { %v1680_v41 = vpop.eup %1679 }
 0x348   :  { %v1682_v36 = vpop.eup %1681 }
 0x34b   :  { %v779_v32 = vpop.xlane.xlu1 %778 }
 0x34c   :  { %1683 = vrcp.f32 %v779_v32 }
 0x34d   :  { %1685 = vrcp.f32 %v773_v28 }
 0x34e   :  { %1687 = vrcp.f32 %v776_v42 }
 0x356   :  { %v1684_v26 = vpop.eup %1683 }
 0x357   :  { %v1686_v46 = vpop.eup %1685 }
 0x358   :  { %v1688_v57 = vpop.eup %1687 }
 0x36a   :  { %v995_v63 = vpop.f32.mrb[24].mxu1 }
 0x36b   :  { %v1303_v1 = vmul.f32 %v1674_v62, %v995_v63  ;;  %v1550_v2 = vpop.f32.mrb[25].mxu1 }
 0x36c   :  { %v998_v3 = vpop.f32.mrb[26].mxu1 }
 0x36d   :  { %v1319_v11 = vadd.f32 %v2114_v0, %v1303_v1  ;;  %v1551_v6 = vpop.f32.mrb[27].mxu1 }
 0x36f   :  { %1327 = vst [vmem:[#allocation8] sm:$0x1] %v1319_v11 }
 0x372   :  { %v1038_v8 = vpop.f32.mrb[28].mxu1 }
 0x373   :  { %v1305_v9 = vmul.f32 %v1676_v7, %v1038_v8  ;;  %v1556_v12 = vpop.f32.mrb[29].mxu1 }
 0x374   :  { %v1041_v13 = vpop.f32.mrb[30].mxu1 }
 0x375   :  { %v1320_v14 = vadd.f32 %v2114_v0, %v1305_v9  ;;  %v1557_v15 = vpop.f32.mrb[31].mxu1 }
 0x377   :  { %1328 = vst [vmem:[#allocation8 + $0x1] sm:$0x1] %v1320_v14 }
 0x37a   :  { %v1081_v18 = vpop.f32.mrb[32].mxu1 }
 0x37b   :  { %v1307_v19 = vmul.f32 %v1678_v17, %v1081_v18  ;;  %v1562_v20 = vpop.f32.mrb[33].mxu1 }
 0x37c   :  { %v1084_v21 = vpop.f32.mrb[34].mxu1 }
 0x37d   :  { %v1321_v22 = vadd.f32 %v2114_v0, %v1307_v19  ;;  %v1563_v23 = vpop.f32.mrb[35].mxu1 }
 0x37f   :  { %1329 = vst [vmem:[#allocation8 + $0x2] sm:$0x1] %v1321_v22 }
 0x383   :  { %v1124_v52 = vpop.f32.mrb[36].mxu1 }
 0x384   :  { %v1309_v30 = vmul.f32 %v1680_v41, %v1124_v52  ;;  %v1568_v31 = vpop.f32.mrb[37].mxu1 }
 0x385   :  { %v1127_v34 = vpop.f32.mrb[38].mxu1 }
 0x386   :  { %v1322_v5 = vadd.f32 %v2114_v0, %v1309_v30  ;;  %v1569_v35 = vpop.f32.mrb[39].mxu1 }
 0x388   :  { %1330 = vst [vmem:[#allocation8 + $0x3] sm:$0x1] %v1322_v5 }
 0x38b   :  { %v1167_v37 = vpop.f32.mrb[40].mxu1 }
 0x38c   :  { %v1311_v39 = vmul.f32 %v1682_v36, %v1167_v37  ;;  %v1574_v40 = vpop.f32.mrb[41].mxu1 }
 0x38d   :  { %v1170_v10 = vpop.f32.mrb[42].mxu1 }
 0x38e   :  { %v1323_v44 = vadd.f32 %v2114_v0, %v1311_v39  ;;  %v1575_v25 = vpop.f32.mrb[43].mxu1 }
 0x390   :  { %1331 = vst [vmem:[#allocation8 + $0x4] sm:$0x1] %v1323_v44 }
 0x392   :  { %v1296_v45 = vpop.f32.mrb[40].mxu0 }
 0x393   :  { %v1210_v47 = vpop.f32.mrb[44].mxu1  ;;  %v1317_v48 = vmul.f32 %v1684_v26, %v1296_v45  ;;  %v1592_v43 = vpop.f32.mrb[41].mxu0 }
 0x394   :  { %v1313_v49 = vmul.f32 %v1686_v46, %v1210_v47  ;;  %v1580_v50 = vpop.f32.mrb[45].mxu1  ;;  %v1299_v53 = vpop.f32.mrb[42].mxu0 }
 0x395   :  { %v1326_v27 = vadd.f32 %v2114_v0, %v1317_v48  ;;  %v1213_v54 = vpop.f32.mrb[46].mxu1  ;;  %v1593_v55 = vpop.f32.mrb[43].mxu0 }
 0x396   :  { %v1324_v56 = vadd.f32 %v2114_v0, %v1313_v49  ;;  %v1581_v51 = vpop.f32.mrb[47].mxu1 }
 0x397   :  { %1334 = vst [vmem:[#allocation8 + $0x7] sm:$0x1] %v1326_v27 }
 0x398   :  { %1332 = vst [vmem:[#allocation8 + $0x5] sm:$0x1] %v1324_v56 }
 0x39b   :  { %v1253_v58 = vpop.f32.mrb[48].mxu1 }
 0x39c   :  { %v1315_v29 = vmul.f32 %v1688_v57, %v1253_v58  ;;  %v1586_v33 = vpop.f32.mrb[49].mxu1 }
 0x39d   :  { %v1256_v38 = vpop.f32.mrb[50].mxu1 }
 0x39e   :  { %v1325_v59 = vadd.f32 %v2114_v0, %v1315_v29  ;;  %v1587_v60 = vpop.f32.mrb[51].mxu1 }
 0x3a0   :  { %1333 = vst [vmem:[#allocation8 + $0x6] sm:$0x1] %v1325_v59 }
 0x3a1   :  { %1744 = shalt.err (!%p1741_p6)
}
 0x3a2   :  { %s1745_s10 = scalar_lea.hbm %s2144_s8, 128 }
 0x3a3   :  { %p1746_p7 = scmp.ne.s32.totalorder %s2144_s8, %s1745_s10  ;;  %p1749_p8 = scmp.lt.u32.totalorder %s1745_s10, %s2144_s8 }
 0x3a5   :  { %p1751_p9 = pnand %p1749_p8, %p1746_p7 }
 0x3a7   :  { %1754 = shalt.err (!%p1751_p9)
}
 0x3a8   :  { %s1770_s13 = smov 16   ;;  %s1771_s14 = smov 1  }
 0x3a9   :  { %1346 = dma.vmem_to_hbm [thread:$0]  %s1341_s29, 128, %s2144_s8, [#allocation5], %s1770_s13, %s1770_s13, %s1771_s14  }
 0x3aa   :  { %1759 = dma.done.wait [#allocation5], 128  }
 0x3ab   :  { %1760 = vsyncadd [#allocation5], 4294967168 }
 0x3ac   :  { %1350 = vsyncpa [#allocation4], 1 }
 0x3ad   :  { %1351 = vsyncpa [#allocation7], 1 }
 0x3ae   :  { %1352 = vsyncpa [#allocation5], 1 }

</bundles_post_ra>
